<compile_context>
chip_gen: v7x
topology: tpu7x:2x2x1
jax: 0.10.0
libtpu: 0.0.40
codegen_flags: <defaults>
</compile_context>

<pallas_src>
import functools

import jax
import jax.numpy as jnp
from jax.experimental import pallas as pl
from jax.experimental.pallas import tpu as pltpu


def _round_up(x: int, m: int) -> int:
    return ((x + m - 1) // m) * m


def _make_mlp_kernel(num_layers: int, sigmoid_output: bool):
    """Fused kernel: x -> [Linear -> ReLU]*(L-1) -> Linear [-> sigmoid]."""

    def kernel(*refs):
        x_ref = refs[0]
        out_ref = refs[-1]
        wb = refs[1:-1]  # w0, b0, w1, b1, ..., w_{L-1}, b_{L-1}

        # In-kernel cast: x DMA stays in the caller's dtype, MXU inputs bf16.
        h = x_ref[...].astype(jnp.bfloat16)
        acc = None
        for i in range(num_layers):
            w = wb[2 * i][...]      # bf16 [in_i, out_i]
            b = wb[2 * i + 1][...]  # f32  [1,    out_i]
            # bf16 x bf16 -> f32 accumulate on the MXU; epilogue in f32.
            acc = jnp.dot(h, w, preferred_element_type=jnp.float32) + b
            if i < num_layers - 1:
                h = jnp.maximum(acc, 0.0).astype(jnp.bfloat16)  # ReLU, back to bf16
        if sigmoid_output:
            acc = jax.nn.sigmoid(acc)  # f32, EUP
        out_ref[...] = acc.astype(out_ref.dtype)

    return kernel


def prepare_mlp_params(weights, biases):
    """One-time weight preprocessing (hoisted out of the per-call path).

    weights[i]: [out_i, in_i]  (PyTorch nn.Linear convention) -> bf16 [in_i, out_i]
    biases[i] : [out_i]                                        -> f32  [1,    out_i]
    """
    params = []
    for w, b in zip(weights, biases):
        wt = jnp.asarray(w, jnp.float32).T.astype(jnp.bfloat16)
        bb = jnp.asarray(b, jnp.float32).reshape(1, -1)
        params.append((wt, bb))
    return params


def mlp_pallas(x, params, *, sigmoid_output=False, tm=None):
    """Run the MLP on x of shape (..., input_dim) with prepared params."""
    num_layers = len(params)
    orig_shape = x.shape
    in_dim = orig_shape[-1]
    out_dim = params[-1][0].shape[1]

    x2 = x.reshape(-1, in_dim)  # collapse leading dims (bitcast, no copy)
    n_tok = x2.shape[0]
    if n_tok == 0:  # guard: empty grid is not allowed
        return jnp.zeros((*orig_shape[:-1], out_dim), x.dtype)

    # ---- VMEM footprint bookkeeping ----------------------------------------
    x_itemsize = jnp.dtype(x.dtype).itemsize
    # x tile + out tile, double-buffered by the pipeline.
    per_row = 2 * (in_dim * x_itemsize + out_dim * x_itemsize)
    # Resident weights/biases (constant index_map; count default 2 buffers).
    w_bytes = sum(
        2 * (wt.size * jnp.dtype(wt.dtype).itemsize + b.size * jnp.dtype(b.dtype).itemsize)
        for wt, b in params
    )

    # ---- token tile selection ----------------------------------------------
    if tm is None:
        if n_tok >= 2048:
            tm = 1024                                  # big streaming tiles, grid >= 2
        elif n_tok >= 256:
            tm = _round_up(-(-n_tok // 2), 8)          # keep >= 2 tiles for v7x megacore
        else:
            tm = _round_up(n_tok, 8)                   # single tile
    tm = _round_up(min(tm, _round_up(n_tok, 8)), 8)
    # Cap tm so activations + resident weights stay well inside v7x's 64 MiB
    # (and any raised v5e scoped limit).
    budget = 24 * 1024 * 1024
    while tm > 64 and tm * per_row + w_bytes > budget:
        tm = _round_up(tm // 2, 8)

    grid = (pl.cdiv(n_tok, tm),)  # partial final block handled by Pallas

    kernel = _make_mlp_kernel(num_layers, sigmoid_output)

    # x / out: tiled over tokens with unpadded feature dims (block dim equals
    # the full array dim).  Weights / biases: full-array blocks with constant
    # index_maps -> DMA'd once and VMEM-resident across the grid.
    in_specs = [pl.BlockSpec((tm, in_dim), lambda i: (i, 0))]
    flat_args = [x2]
    for wt, b in params:
        in_specs.append(pl.BlockSpec(wt.shape, lambda i: (0, 0)))
        in_specs.append(pl.BlockSpec(b.shape, lambda i: (0, 0)))
        flat_args.extend([wt, b])
    out_spec = pl.BlockSpec((tm, out_dim), lambda i: (i, 0))

    est_bytes = tm * per_row + w_bytes
    vmem_limit = int(min(max(2 * est_bytes, 32 * 1024 * 1024), 48 * 1024 * 1024))

    out = pl.pallas_call(
        kernel,
        out_shape=jax.ShapeDtypeStruct((n_tok, out_dim), x.dtype),
        grid_spec=pltpu.PrefetchScalarGridSpec(
            num_scalar_prefetch=0,
            grid=grid,
            in_specs=in_specs,
            out_specs=out_spec,
        ),
        compiler_params=pltpu.CompilerParams(
            dimension_semantics=("parallel",),
            vmem_limit_bytes=vmem_limit,
        ),
    )(*flat_args)

    return out.reshape(*orig_shape[:-1], out_dim)


# ---------------------------- references ------------------------------------
def mlp_reference_f32(x, weights, biases, *, sigmoid_output=False):
    """Pure-f32 reference (matches the PyTorch module's math)."""
    num_layers = len(weights)
    h = x.astype(jnp.float32)
    for i, (w, b) in enumerate(zip(weights, biases)):
        h = h @ jnp.asarray(w, jnp.float32).T + jnp.asarray(b, jnp.float32)
        if i < num_layers - 1:
            h = jnp.maximum(h, 0.0)
    if sigmoid_output:
        h = jax.nn.sigmoid(h)
    return h.astype(x.dtype)


def mlp_reference_bf16(x, weights, biases, *, sigmoid_output=False):
    """Reference matching the kernel's precision (bf16 MXU inputs, f32 acc)."""
    num_layers = len(weights)
    h = x.astype(jnp.bfloat16)
    for i, (w, b) in enumerate(zip(weights, biases)):
        wt = jnp.asarray(w, jnp.float32).T.astype(jnp.bfloat16)
        h = jnp.dot(h, wt, preferred_element_type=jnp.float32)
        h = h + jnp.asarray(b, jnp.float32)
        if i < num_layers - 1:
            h = jnp.maximum(h, 0.0).astype(jnp.bfloat16)
    if sigmoid_output:
        h = jax.nn.sigmoid(h)
    return h.astype(x.dtype)


def init_mlp_params(key, input_dim, hidden_dim, output_dim, num_layers):
    """Deterministic nn.Linear-style init: U(-1/sqrt(fan_in), 1/sqrt(fan_in))."""
    h = [hidden_dim] * (num_layers - 1)
    dims_in = [input_dim] + h
    dims_out = h + [output_dim]
    weights, biases = [], []
    for n, k in zip(dims_in, dims_out):
        key, kw, kb = jax.random.split(key, 3)
        bound = 1.0 / (n ** 0.5)
        weights.append(jax.random.uniform(kw, (k, n), jnp.float32, -bound, bound))
        biases.append(jax.random.uniform(kb, (k,), jnp.float32, -bound, bound))
    return weights, biases


if __name__ == "__main__":
    # Module hyperparameters (small, consistent with the SAM mask-decoder MLP).
    input_dim, hidden_dim, output_dim, num_layers = 32, 64, 16, 3
    sigmoid_output = True

    key = jax.random.PRNGKey(0)
    kx, kx2, kp = jax.random.split(key, 3)

    weights, biases = init_mlp_params(kp, input_dim, hidden_dim, output_dim, num_layers)
    params = prepare_mlp_params(weights, biases)  # one-time, outside the hot path

    run = jax.jit(functools.partial(mlp_pallas, sigmoid_output=sigmoid_output))

    # Primary small case: batch=2, seq=8 tokens, feature dim = input_dim.
    x = jax.random.normal(kx, (2, 8, input_dim), jnp.float32)
    out = jax.block_until_ready(run(x, params))
    assert out.shape == (2, 8, output_dim), out.shape
    ref_bf = mlp_reference_bf16(x, weights, biases, sigmoid_output=sigmoid_output)
    ref_32 = mlp_reference_f32(x, weights, biases, sigmoid_output=sigmoid_output)
    assert jnp.allclose(out, ref_bf, atol=1e-3, rtol=1e-3), "mismatch vs bf16 reference"
    assert jnp.allclose(out, ref_32, atol=2e-2, rtol=2e-2), "mismatch vs f32 reference"

    # Secondary case: 300 tokens -> 2 grid tiles with a partial final block
    # (exercises the cdiv grid / no-token-padding path).
    x2 = jax.random.normal(kx2, (3, 100, input_dim), jnp.float32)
    out2 = jax.block_until_ready(run(x2, params))
    assert out2.shape == (3, 100, output_dim), out2.shape
    ref2 = mlp_reference_bf16(x2, weights, biases, sigmoid_output=sigmoid_output)
    assert jnp.allclose(out2, ref2, atol=1e-3, rtol=1e-3), "mismatch (partial block case)"

    print("KERNEL_OK")
</pallas_src>

<mosaic_0001>
module attributes {stable_mosaic.version = 11 : i64} {
  func.func @kernel(%arg0: i32, %arg1: memref<16x32xf32, #tpu.memory_space<vmem>>, %arg2: memref<32x64xbf16, #tpu.memory_space<vmem>>, %arg3: memref<1x64xf32, #tpu.memory_space<vmem>>, %arg4: memref<64x64xbf16, #tpu.memory_space<vmem>>, %arg5: memref<1x64xf32, #tpu.memory_space<vmem>>, %arg6: memref<64x16xbf16, #tpu.memory_space<vmem>>, %arg7: memref<1x16xf32, #tpu.memory_space<vmem>>, %arg8: memref<16x16xf32, #tpu.memory_space<vmem>>) attributes {dimension_semantics = [#tpu.dimension_semantics<parallel>], iteration_bounds = array<i64: 1>, scalar_prefetch = 0 : i64, scratch_operands = 0 : i64, tpu.core_type = #tpu.core_type<tc>, window_params = [{transform_indices = @transform_0, window_bounds = array<i64: 16, 32>}, {pipeline_mode = #tpu.pipeline_mode<synchronous>, transform_indices = @transform_1, window_bounds = array<i64: 32, 64>}, {pipeline_mode = #tpu.pipeline_mode<synchronous>, transform_indices = @transform_2, window_bounds = array<i64: 1, 64>}, {pipeline_mode = #tpu.pipeline_mode<synchronous>, transform_indices = @transform_3, window_bounds = array<i64: 64, 64>}, {pipeline_mode = #tpu.pipeline_mode<synchronous>, transform_indices = @transform_4, window_bounds = array<i64: 1, 64>}, {pipeline_mode = #tpu.pipeline_mode<synchronous>, transform_indices = @transform_5, window_bounds = array<i64: 64, 16>}, {pipeline_mode = #tpu.pipeline_mode<synchronous>, transform_indices = @transform_6, window_bounds = array<i64: 1, 16>}, {transform_indices = @transform_7, window_bounds = array<i64: 16, 16>}]} {
    %c0 = arith.constant 0 : index
    %c0_0 = arith.constant 0 : index
    %0 = vector.load %arg1[%c0, %c0_0] : memref<16x32xf32, #tpu.memory_space<vmem>>, vector<16x32xf32>
    %1 = arith.truncf %0 : vector<16x32xf32> to vector<16x32xbf16>
    %c0_1 = arith.constant 0 : index
    %c0_2 = arith.constant 0 : index
    %2 = vector.load %arg2[%c0_1, %c0_2] : memref<32x64xbf16, #tpu.memory_space<vmem>>, vector<32x64xbf16>
    %c0_3 = arith.constant 0 : index
    %c0_4 = arith.constant 0 : index
    %3 = vector.load %arg3[%c0_3, %c0_4] : memref<1x64xf32, #tpu.memory_space<vmem>>, vector<1x64xf32>
    %cst = arith.constant dense<0.000000e+00> : vector<16x64xf32>
    %4 = tpu.matmul %1, %2, %cst {dimension_numbers = #tpu.dot_dimension_numbers<[1], [0], [0], [1], [0, 0, 1, 1], [], []>} : vector<16x32xbf16>, vector<32x64xbf16>, vector<16x64xf32> -> vector<16x64xf32>
    %5 = vector.broadcast %3 : vector<1x64xf32> to vector<16x64xf32>
    %6 = arith.addf %4, %5 : vector<16x64xf32>
    %cst_5 = arith.constant 0.000000e+00 : f32
    %7 = vector.broadcast %cst_5 : f32 to vector<16x64xf32>
    %8 = arith.maximumf %6, %7 : vector<16x64xf32>
    %9 = arith.truncf %8 : vector<16x64xf32> to vector<16x64xbf16>
    %c0_6 = arith.constant 0 : index
    %c0_7 = arith.constant 0 : index
    %10 = vector.load %arg4[%c0_6, %c0_7] : memref<64x64xbf16, #tpu.memory_space<vmem>>, vector<64x64xbf16>
    %c0_8 = arith.constant 0 : index
    %c0_9 = arith.constant 0 : index
    %11 = vector.load %arg5[%c0_8, %c0_9] : memref<1x64xf32, #tpu.memory_space<vmem>>, vector<1x64xf32>
    %cst_10 = arith.constant dense<0.000000e+00> : vector<16x64xf32>
    %12 = tpu.matmul %9, %10, %cst_10 {dimension_numbers = #tpu.dot_dimension_numbers<[1], [0], [0], [1], [0, 0, 1, 1], [], []>} : vector<16x64xbf16>, vector<64x64xbf16>, vector<16x64xf32> -> vector<16x64xf32>
    %13 = vector.broadcast %11 : vector<1x64xf32> to vector<16x64xf32>
    %14 = arith.addf %12, %13 : vector<16x64xf32>
    %cst_11 = arith.constant 0.000000e+00 : f32
    %15 = vector.broadcast %cst_11 : f32 to vector<16x64xf32>
    %16 = arith.maximumf %14, %15 : vector<16x64xf32>
    %17 = arith.truncf %16 : vector<16x64xf32> to vector<16x64xbf16>
    %c0_12 = arith.constant 0 : index
    %c0_13 = arith.constant 0 : index
    %18 = vector.load %arg6[%c0_12, %c0_13] : memref<64x16xbf16, #tpu.memory_space<vmem>>, vector<64x16xbf16>
    %c0_14 = arith.constant 0 : index
    %c0_15 = arith.constant 0 : index
    %19 = vector.load %arg7[%c0_14, %c0_15] : memref<1x16xf32, #tpu.memory_space<vmem>>, vector<1x16xf32>
    %cst_16 = arith.constant dense<0.000000e+00> : vector<16x16xf32>
    %20 = tpu.matmul %17, %18, %cst_16 {dimension_numbers = #tpu.dot_dimension_numbers<[1], [0], [0], [1], [0, 0, 1, 1], [], []>} : vector<16x64xbf16>, vector<64x16xbf16>, vector<16x16xf32> -> vector<16x16xf32>
    %21 = vector.broadcast %19 : vector<1x16xf32> to vector<16x16xf32>
    %22 = arith.addf %20, %21 : vector<16x16xf32>
    %23 = arith.negf %22 : vector<16x16xf32>
    %24 = math.exp %23 : vector<16x16xf32>
    %cst_17 = arith.constant 1.000000e+00 : f32
    %25 = vector.broadcast %cst_17 : f32 to vector<16x16xf32>
    %26 = arith.addf %25, %24 : vector<16x16xf32>
    %27 = arith.divf %25, %26 : vector<16x16xf32>
    %c0_18 = arith.constant 0 : index
    %c0_19 = arith.constant 0 : index
    %28 = vector.load %arg8[%c0_18, %c0_19] : memref<16x16xf32, #tpu.memory_space<vmem>>, vector<16x16xf32>
    tpu.vector_store %arg8[%c0_18, %c0_19], %27 {strides = array<i32>} : memref<16x16xf32, #tpu.memory_space<vmem>>, vector<16x16xf32>,
    return
  }
  func.func @transform_0(%arg0: i32) -> (i32, i32) {
    %c0_i32 = arith.constant 0 : i32
    %c0_i32_0 = arith.constant 0 : i32
    return %arg0, %c0_i32 : i32, i32
  }
  func.func @transform_1(%arg0: i32) -> (i32, i32) {
    %c0_i32 = arith.constant 0 : i32
    %c0_i32_0 = arith.constant 0 : i32
    %c0_i32_1 = arith.constant 0 : i32
    return %c0_i32, %c0_i32_0 : i32, i32
  }
  func.func @transform_2(%arg0: i32) -> (i32, i32) {
    %c0_i32 = arith.constant 0 : i32
    %c0_i32_0 = arith.constant 0 : i32
    %c0_i32_1 = arith.constant 0 : i32
    return %c0_i32, %c0_i32_0 : i32, i32
  }
  func.func @transform_3(%arg0: i32) -> (i32, i32) {
    %c0_i32 = arith.constant 0 : i32
    %c0_i32_0 = arith.constant 0 : i32
    %c0_i32_1 = arith.constant 0 : i32
    return %c0_i32, %c0_i32_0 : i32, i32
  }
  func.func @transform_4(%arg0: i32) -> (i32, i32) {
    %c0_i32 = arith.constant 0 : i32
    %c0_i32_0 = arith.constant 0 : i32
    %c0_i32_1 = arith.constant 0 : i32
    return %c0_i32, %c0_i32_0 : i32, i32
  }
  func.func @transform_5(%arg0: i32) -> (i32, i32) {
    %c0_i32 = arith.constant 0 : i32
    %c0_i32_0 = arith.constant 0 : i32
    %c0_i32_1 = arith.constant 0 : i32
    return %c0_i32, %c0_i32_0 : i32, i32
  }
  func.func @transform_6(%arg0: i32) -> (i32, i32) {
    %c0_i32 = arith.constant 0 : i32
    %c0_i32_0 = arith.constant 0 : i32
    %c0_i32_1 = arith.constant 0 : i32
    return %c0_i32, %c0_i32_0 : i32, i32
  }
  func.func @transform_7(%arg0: i32) -> (i32, i32) {
    %c0_i32 = arith.constant 0 : i32
    %c0_i32_0 = arith.constant 0 : i32
    return %arg0, %c0_i32 : i32, i32
  }
}

</mosaic_0001>

<bundles_post_ra>
// kernel: mlp_pallas.1
= control target key start
LH: loop header
LB: loop body
LE: loop exit
PB: predicated region body
PF: predicated region fallthrough
CT: control target
= control target key end

     0   :  { %12 = vsyncpa [#allocation3], 0  ;;  %s571_s0 = inlined_call_operand.vmem [shape: f32[16,32], index: 0, kind: input, shape index: {}]   ;;  %s572_s1 = inlined_call_operand.hbm [shape: bf16[32,64], index: 1, kind: input, shape index: {}]   ;;  %s573_s2 = inlined_call_operand.vmem [shape: f32[1,64], index: 2, kind: input, shape index: {}]   ;;  %s574_s3 = inlined_call_operand.vmem [shape: bf16[64,64], index: 3, kind: input, shape index: {}]   ;;  %s575_s4 = inlined_call_operand.vmem [shape: f32[1,64], index: 4, kind: input, shape index: {}]   ;;  %s576_s5 = inlined_call_operand.vmem [shape: bf16[64,16], index: 5, kind: input, shape index: {}]   ;;  %s577_s6 = inlined_call_operand.vmem [shape: f32[1,16], index: 6, kind: input, shape index: {}]   ;;  %s578_s7 = inlined_call_operand.hbm [shape: f32[16,16], index: 7, kind: output, shape index: {}]  }
   0x1   :  { %13 = vsyncpa [#allocation4], 0  ;;  %s455_s24 = smov [#allocation2]   ;;  %s407_s28 = scalar_lea.hbm %s572_s1, 256 }
   0x2   :  { %s21_s25 = sshll.u32 %s455_s24, 4  ;;  %p408_p0 = scmp.ne.s32.totalorder %s572_s1, %s407_s28  ;;  %s22_s25 = int_to_ptr.vmem [resolvable:$true] %s21_s25 }
   0x3   :  { %p411_p1 = scmp.lt.u32.totalorder %s407_s28, %s572_s1 }
   0x5   :  { %p413_p2 = pnand %p411_p1, %p408_p0 }
   0x7   :  { %416 = shalt.err (!%p413_p2)
}
   0x8   :  { %s417_s10 = scalar_lea.vmem %s22_s25, 256  ;;  %p422_p4 = scmp.lt.s32.totalorder %s22_s25, %s22_s25 }
   0x9   :  { %p418_p3 = scmp.ne.s32.totalorder %s22_s25, %s417_s10  ;;  %p423_p5 = scmp.lt.s32.totalorder %s417_s10, %s417_s10 }
   0xb   :  { %p424_p6 = por %p423_p5, %p422_p4 }
   0xd   :  { %p425_p7 = pnand %p424_p6, %p418_p3 }
   0xf   :  { %428 = shalt.err (!%p425_p7)
}
  0x10   :  { %s456_s11 = smov 64   ;;  %s457_s12 = smov 4  }
  0x11   :  { %27 = dma.hbm_to_vmem [thread:$0]  %s572_s1, 256, %s22_s25, [#allocation3], %s456_s11, %s456_s11, %s457_s12  }
  0x12   :  { %451 = dma.done.wait [#allocation3], 256  }
  0x13   :  { %452 = vsyncadd [#allocation3], 4294967040  ;;  %v458_v0 = vmov 0.0   ;;  %vm459_vm0 = vmmov 0   ;;  %v389_v1 = vld [vmem:[#allocation2] sm:$0xff]   ;;  %v390_v2 = vld [vmem:[#allocation2 + $0x8] sm:$0xff]  }
  0x14   :  { %349 = vmatprep.subr.bf16.mxu0 %v458_v0  ;;  %353 = vmatprep.mubr.msk.bf16.mxu0 %vm459_vm0, %v458_v0  ;;  %v42_v3 = vld [vmem:[%s571_s0] sm:$0xff]  ;;  %v43_v4 = vld [vmem:[%s571_s0 + $0x8] sm:$0xff]  ;;  %vm68_vm1 = vcmask 261120   ;;  %v393_v8 = vld [vmem:[%s574_s3 + $0x10] sm:$0xff]   ;;  %vm155_vm2 = vcmask 523264   ;;  %vm298_vm3 = vcmask 130048  }
  0x15   :  { %357 = vmatprep.subr.bf16.mxu1 %v458_v0  ;;  %365 = vmatprep.mubr.msk.bf16.mxu1 %vm459_vm0, %v458_v0  ;;  %v391_v5 = vld [vmem:[%s574_s3] sm:$0xff]   ;;  %v392_v6 = vld [vmem:[%s574_s3 + $0x8] sm:$0xff]   ;;  %v44_v7 = vpack.c.bf16 %v43_v4, %v42_v3  ;;  %v394_v9 = vld [vmem:[%s574_s3 + $0x18] sm:$0xff]  }
  0x16   :  { %350 = vmatpush3.bf16.msra.mxu0 %v389_v1  ;;  %358 = vmatpush3.bf16.msra.mxu1 %v391_v5  ;;  %v395_v10 = vld [vmem:[%s576_s5] sm:$0xff]   ;;  %v396_v11 = vld [vmem:[%s576_s5 + $0x8] sm:$0xff]   ;;  %v397_v22 = vld [vmem:[%s576_s5 + $0x10] sm:$0xff]  }
  0x17   :  { %351 = vmatprep.subr.bf16.mxu0 %v458_v0  ;;  %359 = vmatprep.subr.bf16.mxu1 %v458_v0  ;;  %v318_v12 = vld [vmem:[%s573_s2] ss:$0 sm:$0xff]  ;;  %v398_v23 = vld [vmem:[%s576_s5 + $0x18] sm:$0xff]  }
  0x18   :  { %v322_v24 = vld [vmem:[%s575_s4] ss:$0 sm:$0xff]  ;;  %s460_s4 = smov [#allocation5]  }
  0x19   :  { %v328_v34 = vld [vmem:[%s577_s6] ss:$0 sm:$0xff]  ;;  %s306_s5 = sshll.u32 %s460_s4, 4  ;;  %s307_s5 = int_to_ptr.vmem [resolvable:$true] %s306_s5 }
  0x1a   :  { %352 = vmatpush3.bf16.msra.mxu0 %v390_v2  ;;  %360 = vmatpush3.bf16.msra.mxu1 %v392_v6  ;;  %s429_s6 = scalar_lea.vmem %s307_s5, 256  ;;  %p434_p9 = scmp.lt.s32.totalorder %s307_s5, %s307_s5 }
  0x1b   :  { %369 = vmatprep.subr.bf16.mxu0 %v458_v0  ;;  %361 = vmatprep.subr.bf16.mxu1 %v458_v0  ;;  %p430_p8 = scmp.ne.s32.totalorder %s307_s5, %s429_s6  ;;  %p435_p10 = scmp.lt.s32.totalorder %s429_s6, %s429_s6 }
  0x1d   :  { %354 = vmatmul.mubr.msk.bf16.vlgmr.msra.gmra.mrb[0].mxu0 %vm68_vm1, %v44_v7  ;;  %p436_p11 = por %p435_p10, %p434_p9 }
  0x1e   :  { %377 = vmatprep.mubr.msk.bf16.mxu0 %vm459_vm0, %v458_v0  ;;  %362 = vmatpush3.bf16.msra.mxu1 %v393_v8 }
  0x1f   :  { %363 = vmatprep.subr.bf16.mxu1 %v458_v0  ;;  %370 = vmatpush3.bf16.msra.mxu0 %v395_v10  ;;  %p437_p12 = pnand %p436_p11, %p430_p8 }
  0x20   :  { %371 = vmatprep.subr.bf16.mxu0 %v458_v0 }
  0x22   :  { %364 = vmatpush3.bf16.msra.mxu1 %v394_v9 }
  0x23   :  { %372 = vmatpush3.bf16.msra.mxu0 %v396_v11 }
  0x24   :  { %373 = vmatprep.subr.bf16.mxu0 %v458_v0 }
  0x27   :  { %374 = vmatpush3.bf16.msra.mxu0 %v397_v22 }
  0x28   :  { %375 = vmatprep.subr.bf16.mxu0 %v458_v0 }
  0x2b   :  { %376 = vmatpush3.bf16.msra.mxu0 %v398_v23 }
  0xf0   :  { %v106_v13 = vpop.f32.mrb[0].mxu0 }
  0xf1   :  { %v107_v14 = vadd.f32 %v318_v12, %v106_v13  ;;  %v355_v15 = vpop.f32.mrb[1].mxu0 }
  0xf2   :  { %v109_v16 = vpop.f32.mrb[2].mxu0 }
  0xf3   :  { %v110_v17 = vadd.f32 %v318_v12, %v109_v16  ;;  %v356_v18 = vpop.f32.mrb[3].mxu0  ;;  %v113_v19 = vmax.f32 %v107_v14, 0.0 }
  0xf5   :  { %v114_v20 = vmax.f32 %v110_v17, 0.0 }
  0xf7   :  { %v115_v21 = vpack.c.bf16 %v114_v20, %v113_v19 }
  0xf9   :  { %366 = vmatmul.mubr.msk.bf16.vlgmr.msra.gmra.mrb[0].mxu1 %vm155_vm2, %v115_v21 }
 0x1cc   :  { %v193_v25 = vpop.f32.mrb[0].mxu1 }
 0x1cd   :  { %v194_v26 = vadd.f32 %v322_v24, %v193_v25  ;;  %v367_v27 = vpop.f32.mrb[1].mxu1 }
 0x1ce   :  { %v196_v28 = vpop.f32.mrb[2].mxu1 }
 0x1cf   :  { %v197_v29 = vadd.f32 %v322_v24, %v196_v28  ;;  %v368_v30 = vpop.f32.mrb[3].mxu1  ;;  %v200_v31 = vmax.f32 %v194_v26, 0.0 }
 0x1d1   :  { %v201_v32 = vmax.f32 %v197_v29, 0.0 }
 0x1d3   :  { %v202_v33 = vpack.c.bf16 %v201_v32, %v200_v31 }
 0x1d5   :  { %378 = vmatmul.mubr.msk.bf16.vlgmr.msra.gmra.mrb[4].mxu0 %vm155_vm2, %v202_v33 }
 0x2a8   :  { %v279_v35 = vpop.f32.mrb[4].mxu0 }
 0x2a9   :  { %v280_v36 = vadd.f32 %v328_v34, %v279_v35  ;;  %v379_v37 = vpop.f32.mrb[5].mxu0 }
 0x2aa   :  { %v282_v38 = vpop.f32.mrb[6].mxu0 }
 0x2ab   :  { %v334_v39 = vmul.f32 -1.442695, %v280_v36  ;;  %v283_v40 = vadd.f32 %v328_v34, %v282_v38  ;;  %v380_v41 = vpop.f32.mrb[7].mxu0 }
 0x2ad   :  { %399 = vpow2.f32 %v334_v39  ;;  %v335_v42 = vmul.f32 -1.442695, %v283_v40 }
 0x2af   :  { %401 = vpow2.f32 %v335_v42 }
 0x2b7   :  { %v400_v43 = vpop.eup %399 }
 0x2b8   :  { %v292_v44 = vadd.f32 1.0, %v400_v43 }
 0x2b9   :  { %v402_v45 = vpop.eup %401 }
 0x2ba   :  { %403 = vrcp.f32 %v292_v44  ;;  %v293_v46 = vadd.f32 1.0, %v402_v45 }
 0x2bc   :  { %405 = vrcp.f32 %v293_v46 }
 0x2c4   :  { %v404_v47 = vpop.eup %403 }
 0x2c5   :  { %299 = vst.msk [vmem:[#allocation5] sm:$0xff] %vm298_vm3, %v404_v47 }
 0x2c6   :  { %v406_v48 = vpop.eup %405 }
 0x2c7   :  { %300 = vst.msk [vmem:[#allocation5 + $0x8] sm:$0xff] %vm298_vm3, %v406_v48 }
 0x2c8   :  { %440 = shalt.err (!%p437_p12)
}
 0x2c9   :  { %s441_s16 = scalar_lea.hbm %s578_s7, 256 }
 0x2ca   :  { %p442_p13 = scmp.ne.s32.totalorder %s578_s7, %s441_s16  ;;  %p445_p0 = scmp.lt.u32.totalorder %s441_s16, %s578_s7 }
 0x2cc   :  { %p447_p1 = pnand %p445_p0, %p442_p13 }
 0x2ce   :  { %450 = shalt.err (!%p447_p1)
}
 0x2cf   :  { %s461_s20 = smov 128   ;;  %s462_s21 = smov 8  }
 0x2d0   :  { %312 = dma.vmem_to_hbm [thread:$0]  %s307_s5, 256, %s578_s7, [#allocation4], %s461_s20, %s461_s20, %s462_s21  }
 0x2d1   :  { %453 = dma.done.wait [#allocation4], 256  }
 0x2d2   :  { %454 = vsyncadd [#allocation4], 4294967040 }
 0x2d3   :  { %316 = vsyncpa [#allocation3], 1 }
 0x2d4   :  { %317 = vsyncpa [#allocation4], 1 }

</bundles_post_ra>
